<compile_context>
chip_gen: v7x
topology: tpu7x:2x2x1
jax: 0.10.0
libtpu: 0.0.40
codegen_flags: <defaults>
</compile_context>

<pallas_src>
import functools

import jax
import jax.numpy as jnp
from jax.experimental import pallas as pl
from jax.experimental.pallas import tpu as pltpu


def _round_up(n, m):
    return ((n + m - 1) // m) * m


def _sublane_multiple(dtype):
    return {4: 8, 2: 16, 1: 32}.get(jnp.dtype(dtype).itemsize, 8)


def _vmem_capacity_bytes():
    try:
        info = pltpu.get_tpu_info()
        for attr in ("vmem_capacity_bytes", "vmem_size_bytes", "vmem_bytes"):
            cap = getattr(info, attr, None)
            if cap:
                return int(cap)
    except Exception:
        pass
    return 128 << 20  # v5e/v6e default; v7x (64 MiB) is picked up above.


def _linear_probe_kernel(x_ref, w_ref, b_ref, logits_ref, feat_ref,
                         *, normalize_inputs: bool):
    x = x_ref[...]                                   # (TB, D_pad), native dtype

    # MXU: contract dim 1 of x with dim 1 of weight [TC, D_pad] -> (TB, TC).
    # Transposed-RHS form is native on the MXU; no per-step weight relayout.
    logits = jax.lax.dot_general(
        x, w_ref[...],
        dimension_numbers=(((1,), (1,)), ((), ())),
        preferred_element_type=jnp.float32)

    if normalize_inputs:
        # F.normalize(x, p=2, dim=1) folded into the f32 accumulator:
        # (x / max(||x||, eps)) @ W^T == (x @ W^T) * rsqrt(max(||x||^2, eps^2)).
        xf = x.astype(jnp.float32)
        inv_norm = jax.lax.rsqrt(
            jnp.maximum(jnp.sum(xf * xf, axis=1, keepdims=True), 1e-24))
        logits_ref[...] = (logits * inv_norm + b_ref[...]).astype(logits_ref.dtype)

        @pl.when(pl.program_id(1) == 0)      # features don't depend on class tile
        def _():
            feat_ref[...] = (xf * inv_norm).astype(feat_ref.dtype)
    else:
        logits_ref[...] = (logits + b_ref[...]).astype(logits_ref.dtype)

        @pl.when(pl.program_id(1) == 0)
        def _():
            xf = x.astype(jnp.float32)
            inv_norm = jax.lax.rsqrt(
                jnp.maximum(jnp.sum(xf * xf, axis=1, keepdims=True), 1e-24))
            feat_ref[...] = (xf * inv_norm).astype(feat_ref.dtype)


def linear_probe_forward(x, weight, bias, *, normalize_inputs=False):
    """x: [B, D]; weight: [C, D] (PyTorch nn.Linear layout); bias: [C].

    Returns (logits [B, C] float32, features [B, D] in x.dtype)."""
    B, D = x.shape
    C = weight.shape[0]

    # bf16 activations -> bf16 weight (half the resident footprint, full-rate MXU).
    if x.dtype == jnp.bfloat16 and weight.dtype != jnp.bfloat16:
        weight = weight.astype(jnp.bfloat16)
    x_itemsize = jnp.dtype(x.dtype).itemsize
    w_itemsize = jnp.dtype(weight.dtype).itemsize

    # Lane-dense padding: D and C to multiples of 128 (zero cols/rows are inert:
    # they change neither norms nor logits).
    D_pad = _round_up(max(D, 128), 128)
    C_pad = _round_up(max(C, 128), 128)
    if D_pad != D:
        x = jnp.pad(x, ((0, 0), (0, D_pad - D)))
        weight = jnp.pad(weight, ((0, 0), (0, D_pad - D)))
    if C_pad != C:
        weight = jnp.pad(weight, ((0, C_pad - C), (0, 0)))
        bias = jnp.pad(bias, (0, C_pad - C))
    b2 = bias.astype(jnp.float32).reshape(1, C_pad)

    cap = _vmem_capacity_bytes()
    budget = int(0.70 * cap)                       # working budget for tile sizing
    limit_cap = min(int(0.85 * cap), 100 << 20)    # never exceed per-TC VMEM (v7x 64 MiB)

    # Class tiling: keep the weight fully VMEM-resident when it fits, otherwise
    # stream it in (TC, D_pad) tiles along a second grid axis.
    full_w_bytes = C_pad * D_pad * w_itemsize
    if full_w_bytes <= int(0.40 * budget):
        TC = C_pad
    else:
        tc = int(0.40 * budget) // (2 * D_pad * w_itemsize)   # 2x: streamed, double-buffered
        TC = min(C_pad, max(128, (tc // 128) * 128))
    if C_pad % TC:
        extra = _round_up(C_pad, TC) - C_pad
        weight = jnp.pad(weight, ((0, extra), (0, 0)))
        b2 = jnp.pad(b2, ((0, 0), (0, extra)))
        C_pad += extra
    nc = C_pad // TC
    resident = (nc == 1)

    # Batch tile: largest sublane-aligned tile whose streams + f32 intermediates
    # fit next to the (conservatively double-buffered) weight tile.
    sub = _sublane_multiple(x.dtype)
    w_tile_bytes = 2 * TC * D_pad * w_itemsize
    per_row = (2 * D_pad * x_itemsize        # x in (double-buffered)
               + 2 * D_pad * x_itemsize      # features out (double-buffered)
               + 2 * TC * 4                  # logits out (f32, double-buffered)
               + 2 * D_pad * 4               # f32 intermediates (xf, x*inv_norm)
               + TC * 4)                     # f32 logits before the store cast
    avail = max(budget - w_tile_bytes - (2 << 20), 1 << 20)
    TB = max(sub, min(2048, (avail // per_row // sub) * sub))
    # Keep >= 4 batch tiles when B allows it (megacore sharding on v7x, pipeline depth).
    TB = min(TB, max(sub, _round_up((B + 3) // 4, sub)))

    B_pad = _round_up(B, TB)
    if B_pad != B:
        x = jnp.pad(x, ((0, B_pad - B), (0, 0)))

    vmem_limit = int(
        2 * TB * D_pad * x_itemsize          # x
        + 2 * TB * D_pad * x_itemsize        # features out
        + 2 * TB * TC * 4                    # logits out
        + 2 * TB * D_pad * 4                 # f32 intermediates
        + TB * TC * 4                        # f32 logits accumulator
        + w_tile_bytes                       # weight (covers double-buffered fallback)
        + 4 * TC * 4                         # bias
        + (4 << 20))                         # headroom
    vmem_limit = min(max(vmem_limit, 16 << 20), limit_cap)

    kernel = functools.partial(_linear_probe_kernel,
                               normalize_inputs=normalize_inputs)
    grid = (B_pad // TB, nc)

    def _call(single_buffer_resident):
        res_kw = {"pipeline_mode": pl.Buffered(1)} if single_buffer_resident else {}
        if resident:
            w_map = lambda i, j: (0, 0)
            bias_map = lambda i, j: (0, 0)
        else:
            w_map = lambda i, j: (j, 0)
            bias_map = lambda i, j: (0, j)
        return pl.pallas_call(
            kernel,
            out_shape=(
                jax.ShapeDtypeStruct((B_pad, C_pad), jnp.float32),   # logits
                jax.ShapeDtypeStruct((B_pad, D_pad), x.dtype),       # features
            ),
            grid=grid,
            in_specs=[
                pl.BlockSpec((TB, D_pad), lambda i, j: (i, 0)),      # x: moves with batch tile
                pl.BlockSpec((TC, D_pad), w_map, **res_kw),          # weight
                pl.BlockSpec((1, TC), bias_map, **res_kw),           # bias (f32)
            ],
            out_specs=(
                pl.BlockSpec((TB, TC), lambda i, j: (i, j)),
                pl.BlockSpec((TB, D_pad), lambda i, j: (i, 0)),
            ),
            compiler_params=pltpu.CompilerParams(
                dimension_semantics=("parallel", "arbitrary"),
                vmem_limit_bytes=vmem_limit,
            ),
        )(x, weight, b2)

    if resident:
        try:
            # Constant-index weight/bias: single-buffer them so the resident
            # footprint is 1x, not 2x (biggest win on v7x's 64 MiB VMEM).
            logits, feats = _call(True)
            jax.block_until_ready((logits, feats))
        except Exception:
            # Fallback for JAX builds where pipeline_mode isn't honored on TPU.
            logits, feats = _call(False)
    else:
        logits, feats = _call(False)

    return logits[:B, :C], feats[:B, :D]


def _reference(x, weight, bias, normalize_inputs):
    eps = 1e-12
    norm = jnp.maximum(jnp.linalg.norm(x, axis=1, keepdims=True), eps)
    x_norm = x / norm
    lin_in = x_norm if normalize_inputs else x
    logits = lin_in @ weight.T + bias
    feats = x_norm
    return logits, feats


if __name__ == "__main__":
    B, D, C = 8, 32, 16  # batch, input_dim, num_classes

    key = jax.random.PRNGKey(0)
    kx, kw, kb = jax.random.split(key, 3)
    x = jax.random.normal(kx, (B, D), dtype=jnp.float32)
    # nn.Linear shapes: weight [C, D], bias [C]
    weight = jax.random.normal(kw, (C, D), dtype=jnp.float32) * (1.0 / jnp.sqrt(D))
    bias = jax.random.normal(kb, (C,), dtype=jnp.float32) * 0.01

    ok = True
    for normalize_inputs in (False, True):
        logits, feats = linear_probe_forward(
            x, weight, bias, normalize_inputs=normalize_inputs)
        jax.block_until_ready((logits, feats))

        ref_logits, ref_feats = _reference(x, weight, bias, normalize_inputs)
        ok &= bool(jnp.allclose(logits, ref_logits, atol=1e-4, rtol=1e-4))
        ok &= bool(jnp.allclose(feats, ref_feats, atol=1e-5, rtol=1e-5))

    if ok:
        print("KERNEL_OK")
    else:
        print("MISMATCH")
</pallas_src>

<mosaic_0001>
module attributes {stable_mosaic.version = 11 : i64} {
  func.func @_linear_probe_kernel(%arg0: i32, %arg1: i32, %arg2: memref<8x128xf32, #tpu.memory_space<vmem>>, %arg3: memref<128x128xf32, #tpu.memory_space<vmem>>, %arg4: memref<1x128xf32, #tpu.memory_space<vmem>>, %arg5: memref<8x128xf32, #tpu.memory_space<vmem>>, %arg6: memref<8x128xf32, #tpu.memory_space<vmem>>) attributes {dimension_semantics = [#tpu.dimension_semantics<parallel>, #tpu.dimension_semantics<arbitrary>], iteration_bounds = array<i64: 1, 1>, scalar_prefetch = 0 : i64, scratch_operands = 0 : i64, tpu.core_type = #tpu.core_type<tc>, window_params = [{transform_indices = @transform_0, window_bounds = array<i64: 8, 128>}, {pipeline_mode = #tpu.pipeline_mode<synchronous>, transform_indices = @transform_1, window_bounds = array<i64: 128, 128>}, {pipeline_mode = #tpu.pipeline_mode<synchronous>, transform_indices = @transform_2, window_bounds = array<i64: 1, 128>}, {transform_indices = @transform_3, window_bounds = array<i64: 8, 128>}, {transform_indices = @transform_4, window_bounds = array<i64: 8, 128>}]} {
    %c0 = arith.constant 0 : index
    %c0_0 = arith.constant 0 : index
    %0 = vector.load %arg2[%c0, %c0_0] : memref<8x128xf32, #tpu.memory_space<vmem>>, vector<8x128xf32>
    %c0_1 = arith.constant 0 : index
    %c0_2 = arith.constant 0 : index
    %1 = vector.load %arg3[%c0_1, %c0_2] : memref<128x128xf32, #tpu.memory_space<vmem>>, vector<128x128xf32>
    %cst = arith.constant dense<0.000000e+00> : vector<8x128xf32>
    %2 = tpu.matmul %0, %1, %cst {dimension_numbers = #tpu.dot_dimension_numbers<[1], [1], [0], [0], [0, 0, 1, 0], [], []>} : vector<8x128xf32>, vector<128x128xf32>, vector<8x128xf32> -> vector<8x128xf32>
    %c0_3 = arith.constant 0 : index
    %c0_4 = arith.constant 0 : index
    %3 = vector.load %arg4[%c0_3, %c0_4] : memref<1x128xf32, #tpu.memory_space<vmem>>, vector<1x128xf32>
    %4 = vector.broadcast %3 : vector<1x128xf32> to vector<8x128xf32>
    %5 = arith.addf %2, %4 : vector<8x128xf32>
    %c0_5 = arith.constant 0 : index
    %c0_6 = arith.constant 0 : index
    %6 = vector.load %arg5[%c0_5, %c0_6] : memref<8x128xf32, #tpu.memory_space<vmem>>, vector<8x128xf32>
    tpu.vector_store %arg5[%c0_5, %c0_6], %5 {strides = array<i32>} : memref<8x128xf32, #tpu.memory_space<vmem>>, vector<8x128xf32>,
    %c0_i32 = arith.constant 0 : i32
    %7 = arith.cmpi eq, %arg1, %c0_i32 : i32
    %8 = arith.extui %7 : i1 to i32
    %c0_i32_7 = arith.constant 0 : i32
    %9 = arith.cmpi ne, %8, %c0_i32_7 : i32
    scf.if %9 {
      %10 = arith.mulf %0, %0 : vector<8x128xf32>
      %cst_8 = arith.constant dense<0.000000e+00> : vector<8xf32>
      %11 = vector.multi_reduction <add>, %10, %cst_8 [1] : vector<8x128xf32> to vector<8xf32>
      %12 = vector.shape_cast %11 : vector<8xf32> to vector<8x1xf32>
      %cst_9 = arith.constant 1.000000e-24 : f32
      %13 = vector.broadcast %cst_9 : f32 to vector<8x1xf32>
      %14 = arith.maximumf %12, %13 : vector<8x1xf32>
      %15 = math.rsqrt %14 : vector<8x1xf32>
      %16 = vector.broadcast %15 : vector<8x1xf32> to vector<8x128xf32>
      %17 = arith.mulf %0, %16 : vector<8x128xf32>
      %c0_10 = arith.constant 0 : index
      %c0_11 = arith.constant 0 : index
      %18 = vector.load %arg6[%c0_10, %c0_11] : memref<8x128xf32, #tpu.memory_space<vmem>>, vector<8x128xf32>
      tpu.vector_store %arg6[%c0_10, %c0_11], %17 {strides = array<i32>} : memref<8x128xf32, #tpu.memory_space<vmem>>, vector<8x128xf32>,
    } else {
    }
    return
  }
  func.func @transform_0(%arg0: i32, %arg1: i32) -> (i32, i32) {
    %c0_i32 = arith.constant 0 : i32
    %c0_i32_0 = arith.constant 0 : i32
    return %arg0, %c0_i32 : i32, i32
  }
  func.func @transform_1(%arg0: i32, %arg1: i32) -> (i32, i32) {
    %c0_i32 = arith.constant 0 : i32
    %c0_i32_0 = arith.constant 0 : i32
    %c0_i32_1 = arith.constant 0 : i32
    return %c0_i32, %c0_i32_0 : i32, i32
  }
  func.func @transform_2(%arg0: i32, %arg1: i32) -> (i32, i32) {
    %c0_i32 = arith.constant 0 : i32
    %c0_i32_0 = arith.constant 0 : i32
    %c0_i32_1 = arith.constant 0 : i32
    return %c0_i32, %c0_i32_0 : i32, i32
  }
  func.func @transform_3(%arg0: i32, %arg1: i32) -> (i32, i32) {
    %c0_i32 = arith.constant 0 : i32
    return %arg0, %arg1 : i32, i32
  }
  func.func @transform_4(%arg0: i32, %arg1: i32) -> (i32, i32) {
    %c0_i32 = arith.constant 0 : i32
    %c0_i32_0 = arith.constant 0 : i32
    return %arg0, %c0_i32 : i32, i32
  }
}

module attributes {stable_mosaic.version = 11 : i64} {
  func.func @_linear_probe_kernel(%arg0: i32, %arg1: i32, %arg2: memref<8x128xf32, #tpu.memory_space<vmem>>, %arg3: memref<128x128xf32, #tpu.memory_space<vmem>>, %arg4: memref<1x128xf32, #tpu.memory_space<vmem>>, %arg5: memref<8x128xf32, #tpu.memory_space<vmem>>, %arg6: memref<8x128xf32, #tpu.memory_space<vmem>>) attributes {dimension_semantics = [#tpu.dimension_semantics<parallel>, #tpu.dimension_semantics<arbitrary>], iteration_bounds = array<i64: 1, 1>, scalar_prefetch = 0 : i64, scratch_operands = 0 : i64, tpu.core_type = #tpu.core_type<tc>, window_params = [{transform_indices = @transform_0, window_bounds = array<i64: 8, 128>}, {pipeline_mode = #tpu.pipeline_mode<synchronous>, transform_indices = @transform_1, window_bounds = array<i64: 128, 128>}, {pipeline_mode = #tpu.pipeline_mode<synchronous>, transform_indices = @transform_2, window_bounds = array<i64: 1, 128>}, {transform_indices = @transform_3, window_bounds = array<i64: 8, 128>}, {transform_indices = @transform_4, window_bounds = array<i64: 8, 128>}]} {
    %c0 = arith.constant 0 : index
    %c0_0 = arith.constant 0 : index
    %0 = vector.load %arg2[%c0, %c0_0] : memref<8x128xf32, #tpu.memory_space<vmem>>, vector<8x128xf32>
    %c0_1 = arith.constant 0 : index
    %c0_2 = arith.constant 0 : index
    %1 = vector.load %arg3[%c0_1, %c0_2] : memref<128x128xf32, #tpu.memory_space<vmem>>, vector<128x128xf32>
    %cst = arith.constant dense<0.000000e+00> : vector<8x128xf32>
    %2 = tpu.matmul %0, %1, %cst {dimension_numbers = #tpu.dot_dimension_numbers<[1], [1], [0], [0], [0, 0, 1, 0], [], []>} : vector<8x128xf32>, vector<128x128xf32>, vector<8x128xf32> -> vector<8x128xf32>
    %c0_3 = arith.constant 0 : index
    %c0_4 = arith.constant 0 : index
    %3 = vector.load %arg4[%c0_3, %c0_4] : memref<1x128xf32, #tpu.memory_space<vmem>>, vector<1x128xf32>
    %4 = vector.broadcast %3 : vector<1x128xf32> to vector<8x128xf32>
    %5 = arith.addf %2, %4 : vector<8x128xf32>
    %c0_5 = arith.constant 0 : index
    %c0_6 = arith.constant 0 : index
    %6 = vector.load %arg5[%c0_5, %c0_6] : memref<8x128xf32, #tpu.memory_space<vmem>>, vector<8x128xf32>
    tpu.vector_store %arg5[%c0_5, %c0_6], %5 {strides = array<i32>} : memref<8x128xf32, #tpu.memory_space<vmem>>, vector<8x128xf32>,
    %c0_i32 = arith.constant 0 : i32
    %7 = arith.cmpi eq, %arg1, %c0_i32 : i32
    %8 = arith.extui %7 : i1 to i32
    %c0_i32_7 = arith.constant 0 : i32
    %9 = arith.cmpi ne, %8, %c0_i32_7 : i32
    scf.if %9 {
      %10 = arith.mulf %0, %0 : vector<8x128xf32>
      %cst_8 = arith.constant dense<0.000000e+00> : vector<8xf32>
      %11 = vector.multi_reduction <add>, %10, %cst_8 [1] : vector<8x128xf32> to vector<8xf32>
      %12 = vector.shape_cast %11 : vector<8xf32> to vector<8x1xf32>
      %cst_9 = arith.constant 1.000000e-24 : f32
      %13 = vector.broadcast %cst_9 : f32 to vector<8x1xf32>
      %14 = arith.maximumf %12, %13 : vector<8x1xf32>
      %15 = math.rsqrt %14 : vector<8x1xf32>
      %16 = vector.broadcast %15 : vector<8x1xf32> to vector<8x128xf32>
      %17 = arith.mulf %0, %16 : vector<8x128xf32>
      %c0_10 = arith.constant 0 : index
      %c0_11 = arith.constant 0 : index
      %18 = vector.load %arg6[%c0_10, %c0_11] : memref<8x128xf32, #tpu.memory_space<vmem>>, vector<8x128xf32>
      tpu.vector_store %arg6[%c0_10, %c0_11], %17 {strides = array<i32>} : memref<8x128xf32, #tpu.memory_space<vmem>>, vector<8x128xf32>,
    } else {
    }
    return
  }
  func.func @transform_0(%arg0: i32, %arg1: i32) -> (i32, i32) {
    %c0_i32 = arith.constant 0 : i32
    %c0_i32_0 = arith.constant 0 : i32
    return %arg0, %c0_i32 : i32, i32
  }
  func.func @transform_1(%arg0: i32, %arg1: i32) -> (i32, i32) {
    %c0_i32 = arith.constant 0 : i32
    %c0_i32_0 = arith.constant 0 : i32
    %c0_i32_1 = arith.constant 0 : i32
    return %c0_i32, %c0_i32_0 : i32, i32
  }
  func.func @transform_2(%arg0: i32, %arg1: i32) -> (i32, i32) {
    %c0_i32 = arith.constant 0 : i32
    %c0_i32_0 = arith.constant 0 : i32
    %c0_i32_1 = arith.constant 0 : i32
    return %c0_i32, %c0_i32_0 : i32, i32
  }
  func.func @transform_3(%arg0: i32, %arg1: i32) -> (i32, i32) {
    %c0_i32 = arith.constant 0 : i32
    return %arg0, %arg1 : i32, i32
  }
  func.func @transform_4(%arg0: i32, %arg1: i32) -> (i32, i32) {
    %c0_i32 = arith.constant 0 : i32
    %c0_i32_0 = arith.constant 0 : i32
    return %arg0, %c0_i32 : i32, i32
  }
}

</mosaic_0001>

<bundles_post_ra>
// kernel: tpu_custom_call.1
= control target key start
LH: loop header
LB: loop body
LE: loop exit
PB: predicated region body
PF: predicated region fallthrough
CT: control target
= control target key end

     0   :  { %10 = vsyncpa [#allocation3], 0  ;;  %s456_s0 = inlined_call_operand.hbm [shape: f32[8,128], index: 0, kind: input, shape index: {}]   ;;  %s457_s1 = inlined_call_operand.hbm [shape: f32[128,128], index: 1, kind: input, shape index: {}]   ;;  %s458_s2 = inlined_call_operand.vmem [shape: f32[1,128], index: 2, kind: input, shape index: {}]   ;;  %s459_s3 = inlined_call_operand.hbm [shape: f32[8,128], index: 3, kind: output, shape index: {0}]   ;;  %s460_s4 = inlined_call_operand.hbm [shape: f32[8,128], index: 4, kind: output, shape index: {1}]  }
   0x1   :  { %11 = vsyncpa [#allocation6], 0 }
   0x2   :  { %12 = vsyncpa [#allocation4], 0 }
   0x3   :  { %13 = vsyncpa [#allocation9], 0  ;;  %s364_s15 = smov [#allocation2]   ;;  %s365_s17 = smov [#allocation5]  }
   0x4   :  { %s20_s16 = sshll.u32 %s364_s15, 4  ;;  %s29_s18 = sshll.u32 %s365_s17, 4  ;;  %s21_s16 = int_to_ptr.vmem [resolvable:$true] %s20_s16  ;;  %s398_s18 = int_to_ptr.vmem [resolvable:$true] %s29_s18 }
   0x5   :  { %s268_s21 = scalar_lea.hbm %s456_s0, 128 }
   0x6   :  { %p269_p0 = scmp.ne.s32.totalorder %s456_s0, %s268_s21  ;;  %p272_p1 = scmp.lt.u32.totalorder %s268_s21, %s456_s0 }
   0x8   :  { %p274_p2 = pnand %p272_p1, %p269_p0 }
   0xa   :  { %277 = shalt.err (!%p274_p2)
}
   0xb   :  { %s278_s26 = scalar_lea.vmem %s21_s16, 128  ;;  %p283_p4 = scmp.lt.s32.totalorder %s21_s16, %s21_s16 }
   0xc   :  { %p279_p3 = scmp.ne.s32.totalorder %s21_s16, %s278_s26  ;;  %p284_p5 = scmp.lt.s32.totalorder %s278_s26, %s278_s26 }
   0xe   :  { %p285_p6 = por %p284_p5, %p283_p4 }
  0x10   :  { %p286_p7 = pnand %p285_p6, %p279_p3 }
  0x12   :  { %289 = shalt.err (!%p286_p7)
}
  0x13   :  { %23 = dma.hbm_to_vmem [thread:$0]  %s456_s0, 128, %s21_s16, [#allocation3]  }
  0x14   :  { %s290_s5 = scalar_lea.hbm %s457_s1, 2048 }
  0x15   :  { %p291_p8 = scmp.ne.s32.totalorder %s457_s1, %s290_s5  ;;  %p294_p9 = scmp.lt.u32.totalorder %s290_s5, %s457_s1 }
  0x17   :  { %p296_p10 = pnand %p294_p9, %p291_p8 }
  0x19   :  { %299 = shalt.err (!%p296_p10)
}
  0x1a   :  { %s300_s10 = scalar_lea.vmem %s398_s18, 2048  ;;  %p305_p12 = scmp.lt.s32.totalorder %s398_s18, %s398_s18 }
  0x1b   :  { %p301_p11 = scmp.ne.s32.totalorder %s398_s18, %s300_s10  ;;  %p306_p13 = scmp.lt.s32.totalorder %s300_s10, %s300_s10 }
  0x1d   :  { %p307_p0 = por %p306_p13, %p305_p12 }
  0x1f   :  { %p308_p1 = pnand %p307_p0, %p301_p11 }
  0x21   :  { %311 = shalt.err (!%p308_p1)
}
  0x22   :  { %s366_s0 = smov 128   ;;  %s367_s11 = smov 8  }
  0x23   :  { %35 = dma.hbm_to_vmem [thread:$0]  %s457_s1, 2048, %s398_s18, [#allocation6], %s366_s0, %s366_s0, %s367_s11  }
  0x24   :  { %356 = dma.done.wait [#allocation3], 128  }
  0x25   :  { %357 = vsyncadd [#allocation3], 4294967168 }
  0x26   :  { %358 = dma.done.wait [#allocation6], 2048  }
  0x27   :  { %359 = vsyncadd [#allocation6], 4294965248  ;;  %v368_v0 = vmov 0.0|0.0   ;;  %vm369_vm0 = vmmov 0   ;;  %v370_v1 = vmov 0.0   ;;  %v45_v2 = vld [vmem:[#allocation5] sm:$0xff] }
  0x28   :  { %233 = vmatprep.subr.bf16.mxu0 %v368_v0  ;;  %230 = vmatprep.mubr.msk.f32.mxu0 %vm369_vm0, %v370_v1  ;;  %v46_v3 = vld [vmem:[#allocation5 + $0x8] sm:$0xff]  ;;  %v47_v5 = vld [vmem:[#allocation5 + $0x10] sm:$0xff]  ;;  %v48_v6 = vld [vmem:[#allocation5 + $0x18] sm:$0xff]  ;;  %s371_s1 = smov [#allocation8]  }
  0x29   :  { %v234_v4 = vpack.c.bf16 %v46_v3, %v45_v2  ;;  %v44_v7 = vld [vmem:[#allocation2] sm:$0xff]  ;;  %v237_v9 = vpack.c.bf16 %v48_v6, %v47_v5  ;;  %v49_v10 = vld [vmem:[#allocation5 + $0x20] sm:$0xff]  ;;  %v50_v11 = vld [vmem:[#allocation5 + $0x28] sm:$0xff]  ;;  %s166_s14 = sshll.u32 %s371_s1, 4  ;;  %s167_s14 = int_to_ptr.vmem [resolvable:$true] %s166_s14 }
  0x2a   :  { %v143_v8 = vmul.f32 %v44_v7, %v44_v7  ;;  %v240_v12 = vpack.c.bf16 %v50_v11, %v49_v10  ;;  %v51_v13 = vld [vmem:[#allocation5 + $0x30] sm:$0xff]  ;;  %v52_v14 = vld [vmem:[#allocation5 + $0x38] sm:$0xff]  ;;  %v53_v16 = vld [vmem:[#allocation5 + $0x40] sm:$0xff]  ;;  %s312_s15 = scalar_lea.vmem %s167_s14, 128  ;;  %p317_p3 = scmp.lt.s32.totalorder %s167_s14, %s167_s14 }
  0x2b   :  { %235 = vmatpush3.bf16.xpose.msra.mxu0 %v234_v4  ;;  %v243_v15 = vpack.c.bf16 %v52_v14, %v51_v13  ;;  %v54_v17 = vld [vmem:[#allocation5 + $0x48] sm:$0xff]  ;;  %v55_v19 = vld [vmem:[#allocation5 + $0x50] sm:$0xff]  ;;  %v56_v20 = vld [vmem:[#allocation5 + $0x58] sm:$0xff]  ;;  %p313_p2 = scmp.ne.s32.totalorder %s167_s14, %s312_s15  ;;  %p318_p4 = scmp.lt.s32.totalorder %s312_s15, %s312_s15 }
  0x2c   :  { %236 = vmatprep.subr.bf16.mxu0 %v368_v0  ;;  %144 = vadd.xlane.f32.xlu0 %v143_v8  ;;  %v246_v18 = vpack.c.bf16 %v54_v17, %v53_v16  ;;  %v249_v21 = vpack.c.bf16 %v56_v20, %v55_v19  ;;  %v57_v22 = vld [vmem:[#allocation5 + $0x60] sm:$0xff]  ;;  %v58_v23 = vld [vmem:[#allocation5 + $0x68] sm:$0xff]  ;;  %v59_v25 = vld [vmem:[#allocation5 + $0x70] sm:$0xff] }
  0x2d   :  { %v252_v24 = vpack.c.bf16 %v58_v23, %v57_v22  ;;  %v60_v26 = vld [vmem:[#allocation5 + $0x78] sm:$0xff]  ;;  %p319_p5 = por %p318_p4, %p317_p3 }
  0x2e   :  { %v255_v27 = vpack.c.bf16 %v60_v26, %v59_v25 }
  0x2f   :  { %p320_p6 = pnand %p319_p5, %p313_p2 }
  0x33   :  { %238 = vmatpush3.bf16.xpose.msra.mxu0 %v237_v9 }
  0x34   :  { %239 = vmatprep.subr.bf16.mxu0 %v368_v0 }
  0x3b   :  { %241 = vmatpush3.bf16.xpose.msra.mxu0 %v240_v12 }
  0x3c   :  { %242 = vmatprep.subr.bf16.mxu0 %v368_v0 }
  0x43   :  { %244 = vmatpush3.bf16.xpose.msra.mxu0 %v243_v15 }
  0x44   :  { %245 = vmatprep.subr.bf16.mxu0 %v368_v0 }
  0x4b   :  { %247 = vmatpush3.bf16.xpose.msra.mxu0 %v246_v18 }
  0x4c   :  { %248 = vmatprep.subr.bf16.mxu0 %v368_v0 }
  0x53   :  { %250 = vmatpush3.bf16.xpose.msra.mxu0 %v249_v21 }
  0x54   :  { %251 = vmatprep.subr.bf16.mxu0 %v368_v0 }
  0x5b   :  { %253 = vmatpush3.bf16.xpose.msra.mxu0 %v252_v24 }
  0x5c   :  { %254 = vmatprep.subr.bf16.mxu0 %v368_v0 }
  0x63   :  { %256 = vmatpush3.bf16.xpose.msra.mxu0 %v255_v27 }
  0x6a   :  { %231 = vmatmul.mubr.f32.vlgmr.msra.gmra.mrb[0].mxu0 %v44_v7 }
  0xb9   :  { %v145_v28 = vpop.xlane.xlu0 %144 }
  0xba   :  { %v146_v29 = vmax.f32 %v145_v28, 1e-24 }
  0xbc   :  { %266 = vrsqrt.f32 %v146_v29 }
  0xc6   :  { %v267_v30 = vpop.eup %266 }
  0xc7   :  { %v148_v31 = vmul.f32 %v267_v30, %v44_v7 }
  0xc9   :  { %149 = vst [vmem:[#allocation8] sm:$0xff] %v148_v31 }
  0xca   :  { %323 = shalt.err (!%p320_p6)
}
  0xcb   :  { %s324_s18 = scalar_lea.hbm %s460_s4, 128 }
  0xcc   :  { %p325_p7 = scmp.ne.s32.totalorder %s460_s4, %s324_s18  ;;  %p328_p8 = scmp.lt.u32.totalorder %s324_s18, %s460_s4 }
  0xce   :  { %p330_p9 = pnand %p328_p8, %p325_p7 }
  0xd0   :  { %333 = shalt.err (!%p330_p9)
}
  0xd1   :  { %169 = dma.vmem_to_hbm [thread:$0]  %s167_s14, 128, %s460_s4, [#allocation9]   ;;  %v180_v32 = vld [vmem:[%s458_s2] ss:$0 sm:$0xff] }
  0xd2   :  { %s372_s27 = smov [#allocation7]  }
  0xd3   :  { %s156_s28 = sshll.u32 %s372_s27, 4  ;;  %s157_s28 = int_to_ptr.vmem [resolvable:$true] %s156_s28 }
  0xd4   :  { %s334_s29 = scalar_lea.vmem %s157_s28, 128  ;;  %p339_p11 = scmp.lt.s32.totalorder %s157_s28, %s157_s28 }
  0xd5   :  { %p335_p10 = scmp.ne.s32.totalorder %s157_s28, %s334_s29  ;;  %p340_p12 = scmp.lt.s32.totalorder %s334_s29, %s334_s29 }
  0xd7   :  { %p341_p13 = por %p340_p12, %p339_p11 }
  0xd9   :  { %p342_p0 = pnand %p341_p13, %p335_p10 }
 0x13d   :  { %v134_v33 = vpop.f32.mrb[0].mxu0 }
 0x13e   :  { %v135_v34 = vadd.f32 %v180_v32, %v134_v33  ;;  %v232_v35 = vpop.f32.mrb[1].mxu0 }
 0x140   :  { %138 = vst [vmem:[#allocation7] sm:$0xff] %v135_v34 }
 0x141   :  { %345 = shalt.err (!%p342_p0)
}
 0x142   :  { %s346_s5 = scalar_lea.hbm %s459_s3, 128 }
 0x143   :  { %p347_p1 = scmp.ne.s32.totalorder %s459_s3, %s346_s5  ;;  %p350_p2 = scmp.lt.u32.totalorder %s346_s5, %s459_s3 }
 0x145   :  { %p352_p3 = pnand %p350_p2, %p347_p1 }
 0x147   :  { %355 = shalt.err (!%p352_p3)
}
 0x148   :  { %159 = dma.vmem_to_hbm [thread:$0]  %s157_s28, 128, %s459_s3, [#allocation4]  }
 0x149   :  { %360 = dma.done.wait [#allocation4], 128  }
 0x14a   :  { %361 = vsyncadd [#allocation4], 4294967168 }
 0x14b   :  { %362 = dma.done.wait [#allocation9], 128  }
 0x14c   :  { %363 = vsyncadd [#allocation9], 4294967168 }
 0x14d   :  { %176 = vsyncpa [#allocation3], 1 }
 0x14e   :  { %177 = vsyncpa [#allocation6], 1 }
 0x14f   :  { %178 = vsyncpa [#allocation4], 1 }
 0x150   :  { %179 = vsyncpa [#allocation9], 1 }

// kernel: tpu_custom_call.1
= control target key start
LH: loop header
LB: loop body
LE: loop exit
PB: predicated region body
PF: predicated region fallthrough
CT: control target
= control target key end

     0   :  { %10 = vsyncpa [#allocation3], 0  ;;  %s456_s0 = inlined_call_operand.hbm [shape: f32[8,128], index: 0, kind: input, shape index: {}]   ;;  %s457_s1 = inlined_call_operand.hbm [shape: f32[128,128], index: 1, kind: input, shape index: {}]   ;;  %s458_s2 = inlined_call_operand.vmem [shape: f32[1,128], index: 2, kind: input, shape index: {}]   ;;  %s459_s3 = inlined_call_operand.hbm [shape: f32[8,128], index: 3, kind: output, shape index: {0}]   ;;  %s460_s4 = inlined_call_operand.hbm [shape: f32[8,128], index: 4, kind: output, shape index: {1}]  }
   0x1   :  { %11 = vsyncpa [#allocation6], 0 }
   0x2   :  { %12 = vsyncpa [#allocation4], 0 }
   0x3   :  { %13 = vsyncpa [#allocation9], 0  ;;  %s364_s15 = smov [#allocation2]   ;;  %s365_s17 = smov [#allocation5]  }
   0x4   :  { %s20_s16 = sshll.u32 %s364_s15, 4  ;;  %s29_s18 = sshll.u32 %s365_s17, 4  ;;  %s21_s16 = int_to_ptr.vmem [resolvable:$true] %s20_s16  ;;  %s398_s18 = int_to_ptr.vmem [resolvable:$true] %s29_s18 }
   0x5   :  { %s268_s21 = scalar_lea.hbm %s456_s0, 128 }
   0x6   :  { %p269_p0 = scmp.ne.s32.totalorder %s456_s0, %s268_s21  ;;  %p272_p1 = scmp.lt.u32.totalorder %s268_s21, %s456_s0 }
   0x8   :  { %p274_p2 = pnand %p272_p1, %p269_p0 }
   0xa   :  { %277 = shalt.err (!%p274_p2)
}
   0xb   :  { %s278_s26 = scalar_lea.vmem %s21_s16, 128  ;;  %p283_p4 = scmp.lt.s32.totalorder %s21_s16, %s21_s16 }
   0xc   :  { %p279_p3 = scmp.ne.s32.totalorder %s21_s16, %s278_s26  ;;  %p284_p5 = scmp.lt.s32.totalorder %s278_s26, %s278_s26 }
   0xe   :  { %p285_p6 = por %p284_p5, %p283_p4 }
  0x10   :  { %p286_p7 = pnand %p285_p6, %p279_p3 }
  0x12   :  { %289 = shalt.err (!%p286_p7)
}
  0x13   :  { %23 = dma.hbm_to_vmem [thread:$0]  %s456_s0, 128, %s21_s16, [#allocation3]  }
  0x14   :  { %s290_s5 = scalar_lea.hbm %s457_s1, 2048 }
  0x15   :  { %p291_p8 = scmp.ne.s32.totalorder %s457_s1, %s290_s5  ;;  %p294_p9 = scmp.lt.u32.totalorder %s290_s5, %s457_s1 }
  0x17   :  { %p296_p10 = pnand %p294_p9, %p291_p8 }
  0x19   :  { %299 = shalt.err (!%p296_p10)
}
  0x1a   :  { %s300_s10 = scalar_lea.vmem %s398_s18, 2048  ;;  %p305_p12 = scmp.lt.s32.totalorder %s398_s18, %s398_s18 }
  0x1b   :  { %p301_p11 = scmp.ne.s32.totalorder %s398_s18, %s300_s10  ;;  %p306_p13 = scmp.lt.s32.totalorder %s300_s10, %s300_s10 }
  0x1d   :  { %p307_p0 = por %p306_p13, %p305_p12 }
  0x1f   :  { %p308_p1 = pnand %p307_p0, %p301_p11 }
  0x21   :  { %311 = shalt.err (!%p308_p1)
}
  0x22   :  { %s366_s0 = smov 128   ;;  %s367_s11 = smov 8  }
  0x23   :  { %35 = dma.hbm_to_vmem [thread:$0]  %s457_s1, 2048, %s398_s18, [#allocation6], %s366_s0, %s366_s0, %s367_s11  }
  0x24   :  { %356 = dma.done.wait [#allocation3], 128  }
  0x25   :  { %357 = vsyncadd [#allocation3], 4294967168 }
  0x26   :  { %358 = dma.done.wait [#allocation6], 2048  }
  0x27   :  { %359 = vsyncadd [#allocation6], 4294965248  ;;  %v368_v0 = vmov 0.0|0.0   ;;  %vm369_vm0 = vmmov 0   ;;  %v370_v1 = vmov 0.0   ;;  %v45_v2 = vld [vmem:[#allocation5] sm:$0xff] }
  0x28   :  { %233 = vmatprep.subr.bf16.mxu0 %v368_v0  ;;  %230 = vmatprep.mubr.msk.f32.mxu0 %vm369_vm0, %v370_v1  ;;  %v46_v3 = vld [vmem:[#allocation5 + $0x8] sm:$0xff]  ;;  %v47_v5 = vld [vmem:[#allocation5 + $0x10] sm:$0xff]  ;;  %v48_v6 = vld [vmem:[#allocation5 + $0x18] sm:$0xff]  ;;  %s371_s1 = smov [#allocation8]  }
  0x29   :  { %v234_v4 = vpack.c.bf16 %v46_v3, %v45_v2  ;;  %v44_v7 = vld [vmem:[#allocation2] sm:$0xff]  ;;  %v237_v9 = vpack.c.bf16 %v48_v6, %v47_v5  ;;  %v49_v10 = vld [vmem:[#allocation5 + $0x20] sm:$0xff]  ;;  %v50_v11 = vld [vmem:[#allocation5 + $0x28] sm:$0xff]  ;;  %s166_s14 = sshll.u32 %s371_s1, 4  ;;  %s167_s14 = int_to_ptr.vmem [resolvable:$true] %s166_s14 }
  0x2a   :  { %v143_v8 = vmul.f32 %v44_v7, %v44_v7  ;;  %v240_v12 = vpack.c.bf16 %v50_v11, %v49_v10  ;;  %v51_v13 = vld [vmem:[#allocation5 + $0x30] sm:$0xff]  ;;  %v52_v14 = vld [vmem:[#allocation5 + $0x38] sm:$0xff]  ;;  %v53_v16 = vld [vmem:[#allocation5 + $0x40] sm:$0xff]  ;;  %s312_s15 = scalar_lea.vmem %s167_s14, 128  ;;  %p317_p3 = scmp.lt.s32.totalorder %s167_s14, %s167_s14 }
  0x2b   :  { %235 = vmatpush3.bf16.xpose.msra.mxu0 %v234_v4  ;;  %v243_v15 = vpack.c.bf16 %v52_v14, %v51_v13  ;;  %v54_v17 = vld [vmem:[#allocation5 + $0x48] sm:$0xff]  ;;  %v55_v19 = vld [vmem:[#allocation5 + $0x50] sm:$0xff]  ;;  %v56_v20 = vld [vmem:[#allocation5 + $0x58] sm:$0xff]  ;;  %p313_p2 = scmp.ne.s32.totalorder %s167_s14, %s312_s15  ;;  %p318_p4 = scmp.lt.s32.totalorder %s312_s15, %s312_s15 }
  0x2c   :  { %236 = vmatprep.subr.bf16.mxu0 %v368_v0  ;;  %144 = vadd.xlane.f32.xlu0 %v143_v8  ;;  %v246_v18 = vpack.c.bf16 %v54_v17, %v53_v16  ;;  %v249_v21 = vpack.c.bf16 %v56_v20, %v55_v19  ;;  %v57_v22 = vld [vmem:[#allocation5 + $0x60] sm:$0xff]  ;;  %v58_v23 = vld [vmem:[#allocation5 + $0x68] sm:$0xff]  ;;  %v59_v25 = vld [vmem:[#allocation5 + $0x70] sm:$0xff] }
  0x2d   :  { %v252_v24 = vpack.c.bf16 %v58_v23, %v57_v22  ;;  %v60_v26 = vld [vmem:[#allocation5 + $0x78] sm:$0xff]  ;;  %p319_p5 = por %p318_p4, %p317_p3 }
  0x2e   :  { %v255_v27 = vpack.c.bf16 %v60_v26, %v59_v25 }
  0x2f   :  { %p320_p6 = pnand %p319_p5, %p313_p2 }
  0x33   :  { %238 = vmatpush3.bf16.xpose.msra.mxu0 %v237_v9 }
  0x34   :  { %239 = vmatprep.subr.bf16.mxu0 %v368_v0 }
  0x3b   :  { %241 = vmatpush3.bf16.xpose.msra.mxu0 %v240_v12 }
  0x3c   :  { %242 = vmatprep.subr.bf16.mxu0 %v368_v0 }
  0x43   :  { %244 = vmatpush3.bf16.xpose.msra.mxu0 %v243_v15 }
  0x44   :  { %245 = vmatprep.subr.bf16.mxu0 %v368_v0 }
  0x4b   :  { %247 = vmatpush3.bf16.xpose.msra.mxu0 %v246_v18 }
  0x4c   :  { %248 = vmatprep.subr.bf16.mxu0 %v368_v0 }
  0x53   :  { %250 = vmatpush3.bf16.xpose.msra.mxu0 %v249_v21 }
  0x54   :  { %251 = vmatprep.subr.bf16.mxu0 %v368_v0 }
  0x5b   :  { %253 = vmatpush3.bf16.xpose.msra.mxu0 %v252_v24 }
  0x5c   :  { %254 = vmatprep.subr.bf16.mxu0 %v368_v0 }
  0x63   :  { %256 = vmatpush3.bf16.xpose.msra.mxu0 %v255_v27 }
  0x6a   :  { %231 = vmatmul.mubr.f32.vlgmr.msra.gmra.mrb[0].mxu0 %v44_v7 }
  0xb9   :  { %v145_v28 = vpop.xlane.xlu0 %144 }
  0xba   :  { %v146_v29 = vmax.f32 %v145_v28, 1e-24 }
  0xbc   :  { %266 = vrsqrt.f32 %v146_v29 }
  0xc6   :  { %v267_v30 = vpop.eup %266 }
  0xc7   :  { %v148_v31 = vmul.f32 %v267_v30, %v44_v7 }
  0xc9   :  { %149 = vst [vmem:[#allocation8] sm:$0xff] %v148_v31 }
  0xca   :  { %323 = shalt.err (!%p320_p6)
}
  0xcb   :  { %s324_s18 = scalar_lea.hbm %s460_s4, 128 }
  0xcc   :  { %p325_p7 = scmp.ne.s32.totalorder %s460_s4, %s324_s18  ;;  %p328_p8 = scmp.lt.u32.totalorder %s324_s18, %s460_s4 }
  0xce   :  { %p330_p9 = pnand %p328_p8, %p325_p7 }
  0xd0   :  { %333 = shalt.err (!%p330_p9)
}
  0xd1   :  { %169 = dma.vmem_to_hbm [thread:$0]  %s167_s14, 128, %s460_s4, [#allocation9]   ;;  %v180_v32 = vld [vmem:[%s458_s2] ss:$0 sm:$0xff] }
  0xd2   :  { %s372_s27 = smov [#allocation7]  }
  0xd3   :  { %s156_s28 = sshll.u32 %s372_s27, 4  ;;  %s157_s28 = int_to_ptr.vmem [resolvable:$true] %s156_s28 }
  0xd4   :  { %s334_s29 = scalar_lea.vmem %s157_s28, 128  ;;  %p339_p11 = scmp.lt.s32.totalorder %s157_s28, %s157_s28 }
  0xd5   :  { %p335_p10 = scmp.ne.s32.totalorder %s157_s28, %s334_s29  ;;  %p340_p12 = scmp.lt.s32.totalorder %s334_s29, %s334_s29 }
  0xd7   :  { %p341_p13 = por %p340_p12, %p339_p11 }
  0xd9   :  { %p342_p0 = pnand %p341_p13, %p335_p10 }
 0x13d   :  { %v134_v33 = vpop.f32.mrb[0].mxu0 }
 0x13e   :  { %v135_v34 = vadd.f32 %v180_v32, %v134_v33  ;;  %v232_v35 = vpop.f32.mrb[1].mxu0 }
 0x140   :  { %138 = vst [vmem:[#allocation7] sm:$0xff] %v135_v34 }
 0x141   :  { %345 = shalt.err (!%p342_p0)
}
 0x142   :  { %s346_s5 = scalar_lea.hbm %s459_s3, 128 }
 0x143   :  { %p347_p1 = scmp.ne.s32.totalorder %s459_s3, %s346_s5  ;;  %p350_p2 = scmp.lt.u32.totalorder %s346_s5, %s459_s3 }
 0x145   :  { %p352_p3 = pnand %p350_p2, %p347_p1 }
 0x147   :  { %355 = shalt.err (!%p352_p3)
}
 0x148   :  { %159 = dma.vmem_to_hbm [thread:$0]  %s157_s28, 128, %s459_s3, [#allocation4]  }
 0x149   :  { %360 = dma.done.wait [#allocation4], 128  }
 0x14a   :  { %361 = vsyncadd [#allocation4], 4294967168 }
 0x14b   :  { %362 = dma.done.wait [#allocation9], 128  }
 0x14c   :  { %363 = vsyncadd [#allocation9], 4294967168 }
 0x14d   :  { %176 = vsyncpa [#allocation3], 1 }
 0x14e   :  { %177 = vsyncpa [#allocation6], 1 }
 0x14f   :  { %178 = vsyncpa [#allocation4], 1 }
 0x150   :  { %179 = vsyncpa [#allocation9], 1 }

</bundles_post_ra>
